<compile_context>
chip_gen: v6e
topology: v6e:2x2x1
jax: 0.10.0
libtpu: 0.0.40
codegen_flags: <defaults>
</compile_context>

<pallas_src>
import jax
import jax.numpy as jnp
from jax.experimental import pallas as pl
from jax.experimental.pallas import tpu as pltpu


def _cdiv(a, b):
    return (a + b - 1) // b


def _round_up(x, m):
    return ((x + m - 1) // m) * m


def linear_with_mask_kernel(x_ref, w_ref, scale_ref, bias_ref, o_ref):
    """One (tm, tn) output tile, accumulated over the K grid axis.

    x_ref:     (tm, tk)  activations (bf16 or f32)
    w_ref:     (tn, tk)  weight in nn.Linear layout (out, in)
    scale_ref: (1, tn)   weight mask folded into an output-column scale (f32)
    bias_ref:  (1, tn)   pre-masked bias (bias * bias_mask, f32)
    o_ref:     (tm, tn)  f32 output tile; K-invariant block index, so it stays
                         VMEM-resident across K and doubles as the accumulator.
    """
    k = pl.program_id(2)

    @pl.when(k == 0)
    def _():
        o_ref[...] = jnp.zeros_like(o_ref)

    # MXU matmul in nn.Linear layout: contract x dim 1 against weight dim 1
    # (no materialized .T of the weight tile).
    o_ref[...] += jax.lax.dot_general(
        x_ref[...], w_ref[...],
        dimension_numbers=(((1,), (1,)), ((), ())),
        preferred_element_type=jnp.float32)

    @pl.when(k == pl.num_programs(2) - 1)
    def _():
        # Epilogue: column-scale (weight mask) + masked-bias add, once per tile.
        o_ref[...] = o_ref[...] * scale_ref[...] + bias_ref[...]


def linear_with_mask(x, weight, weight_mask, bias=None, bias_mask=None,
                     *, tm=512, tn=512, tk=1024, mxu_dtype=jnp.bfloat16):
    """Fused masked linear: y = x @ (weight_mask * weight).T + bias_mask * bias.

    x: (M, K); weight: (N, K); weight_mask: (N, 1); bias, bias_mask: (N,).
    """
    M, K = x.shape
    N, K2 = weight.shape
    assert K == K2, "x / weight contraction dims must match"
    out_dtype = x.dtype

    # Fold masks into lane-dense (1, N) f32 epilogue operands (computed once).
    col_scale = jnp.asarray(weight_mask, jnp.float32).reshape(1, N)
    b = jnp.zeros((N,), jnp.float32) if bias is None else jnp.asarray(bias, jnp.float32)
    if bias_mask is not None:
        b = b * jnp.asarray(bias_mask, jnp.float32).reshape(N)
    masked_bias = b.reshape(1, N)

    # Feed the MXU narrow operands; accumulation stays f32 inside the kernel.
    if mxu_dtype is not None and x.dtype != mxu_dtype:
        x = x.astype(mxu_dtype)
        weight = weight.astype(mxu_dtype)
    in_bytes = jnp.dtype(x.dtype).itemsize

    # Tile selection: full-extent block (no padding) when a dim fits in one block,
    # otherwise (8,128)-aligned tiles (defaults are 256-multiples for v6e/v7x MXU).
    def pick(dim, want, align):
        if dim <= want:
            return dim                      # single full-extent block, no pad
        return _round_up(min(want, dim), align)

    tm = pick(M, max(8,   _round_up(tm, 8)),   8)
    tn = pick(N, max(128, _round_up(tn, 128)), 128)
    tk = pick(K, max(128, _round_up(tk, 128)), 128)

    # v7x has 2 TensorCores: guarantee >=2 blocks on a 'parallel' axis when the
    # problem is big enough so both cores get work.
    if _cdiv(M, tm) == 1 and _cdiv(N, tn) == 1 and N >= 256:
        tn = _round_up(_cdiv(N, 2), 128)

    Mp, Np, Kp = _round_up(M, tm), _round_up(N, tn), _round_up(K, tk)

    # TODO(synk): for large ragged K/N, mask the tail tile in-kernel instead of
    # materializing a zero-padded copy of the weight in HBM.
    if (Mp, Kp) != (M, K):
        x = jnp.pad(x, ((0, Mp - M), (0, Kp - K)))
    if (Np, Kp) != (N, K):
        weight = jnp.pad(weight, ((0, Np - N), (0, Kp - K)))
    if Np != N:
        col_scale = jnp.pad(col_scale, ((0, 0), (0, Np - N)))
        masked_bias = jnp.pad(masked_bias, ((0, 0), (0, Np - N)))

    gm, gn, gk = Mp // tm, Np // tn, Kp // tk

    # VMEM budget: double-buffered x/W tiles + K-resident f32 output tile (+ slack).
    vmem_est = 2 * (tm * tk + tn * tk) * in_bytes + 2 * tm * tn * 4 + (1 << 20)
    vmem_limit = int(min(max(vmem_est, 32 << 20), 64 << 20))  # fits v7x physical VMEM

    out = pl.pallas_call(
        linear_with_mask_kernel,
        out_shape=jax.ShapeDtypeStruct((Mp, Np), jnp.float32),
        grid_spec=pltpu.PrefetchScalarGridSpec(
            num_scalar_prefetch=0,
            grid=(gm, gn, gk),
            in_specs=[
                pl.BlockSpec((tm, tk), lambda i, j, k: (i, k)),   # x tile
                pl.BlockSpec((tn, tk), lambda i, j, k: (j, k)),   # weight tile (out, in)
                pl.BlockSpec((1, tn), lambda i, j, k: (0, j)),    # column scale
                pl.BlockSpec((1, tn), lambda i, j, k: (0, j)),    # masked bias
            ],
            out_specs=pl.BlockSpec((tm, tn), lambda i, j, k: (i, j)),
        ),
        compiler_params=pltpu.CompilerParams(
            dimension_semantics=("parallel", "parallel", "arbitrary"),
            vmem_limit_bytes=vmem_limit),
        cost_estimate=pl.CostEstimate(
            flops=2 * Mp * Np * Kp,
            transcendentals=0,
            # x re-streamed gn times, W re-streamed gm times, output written once.
            bytes_accessed=in_bytes * (Mp * Kp * gn + Np * Kp * gm) + 4 * Mp * Np),
    )(x, weight, col_scale, masked_bias)

    out = out[:M, :N]
    if out.dtype != out_dtype:
        out = out.astype(out_dtype)
    return out


if __name__ == "__main__":
    # Small shapes consistent with the module: batch=2, seq=8, in_features=32, out_features=64.
    batch, seq, in_features, out_features = 2, 8, 32, 64
    M = batch * seq

    key = jax.random.PRNGKey(0)
    kx, kw, kb, kwm, kbm = jax.random.split(key, 5)

    x = jax.random.normal(kx, (batch, seq, in_features), dtype=jnp.float32)
    # nn.Linear-style parameters (deterministic init, not a checkpoint load).
    weight = jax.random.normal(kw, (out_features, in_features), dtype=jnp.float32) * 0.1
    bias = jax.random.normal(kb, (out_features,), dtype=jnp.float32) * 0.1
    # Masks: weight mask in 'vector_output' mode -> (out_features, 1);
    #        bias mask in 'vector_input' mode -> (out_features,).
    weight_mask = jax.random.uniform(kwm, (out_features, 1), dtype=jnp.float32)
    bias_mask = jax.random.uniform(kbm, (out_features,), dtype=jnp.float32)

    x2d = x.reshape(M, in_features)
    ref = x2d @ (weight * weight_mask).T + bias * bias_mask   # plain-JAX reference

    # Production path: bf16 MXU operands, f32 accumulation.
    out_bf16 = linear_with_mask(x2d, weight, weight_mask, bias, bias_mask)
    jax.block_until_ready(out_bf16)
    assert jnp.allclose(out_bf16, ref, rtol=2e-2, atol=2e-2), "bf16-path mismatch vs reference"

    # f32 path: tight check of the kernel structure / mask-then-matmul semantics.
    out_f32 = linear_with_mask(x2d, weight, weight_mask, bias, bias_mask,
                               mxu_dtype=jnp.float32)
    jax.block_until_ready(out_f32)
    assert jnp.allclose(out_f32, ref, rtol=1e-5, atol=1e-5), "f32-path mismatch vs reference"

    out = out_bf16.reshape(batch, seq, out_features)
    jax.block_until_ready(out)
    print("KERNEL_OK")
</pallas_src>

<mosaic_0001>
module attributes {stable_mosaic.version = 11 : i64} {
  func.func @linear_with_mask_kernel(%arg0: i32, %arg1: i32, %arg2: i32, %arg3: memref<16x32xbf16, #tpu.memory_space<vmem>>, %arg4: memref<64x32xbf16, #tpu.memory_space<vmem>>, %arg5: memref<1x64xf32, #tpu.memory_space<vmem>>, %arg6: memref<1x64xf32, #tpu.memory_space<vmem>>, %arg7: memref<16x64xf32, #tpu.memory_space<vmem>>) attributes {dimension_semantics = [#tpu.dimension_semantics<parallel>, #tpu.dimension_semantics<parallel>, #tpu.dimension_semantics<arbitrary>], iteration_bounds = array<i64: 1, 1, 1>, scalar_prefetch = 0 : i64, scratch_operands = 0 : i64, tpu.core_type = #tpu.core_type<tc>, window_params = [{transform_indices = @transform_0, window_bounds = array<i64: 16, 32>}, {transform_indices = @transform_1, window_bounds = array<i64: 64, 32>}, {transform_indices = @transform_2, window_bounds = array<i64: 1, 64>}, {transform_indices = @transform_3, window_bounds = array<i64: 1, 64>}, {transform_indices = @transform_4, window_bounds = array<i64: 16, 64>}]} {
    %c0_i32 = arith.constant 0 : i32
    %0 = arith.cmpi eq, %arg2, %c0_i32 : i32
    %1 = arith.extui %0 : i1 to i32
    %c0_i32_0 = arith.constant 0 : i32
    %2 = arith.cmpi ne, %1, %c0_i32_0 : i32
    scf.if %2 {
      %cst_10 = arith.constant 0.000000e+00 : f32
      %12 = vector.broadcast %cst_10 : f32 to vector<16x64xf32>
      %c0_11 = arith.constant 0 : index
      %c0_12 = arith.constant 0 : index
      %13 = vector.load %arg7[%c0_11, %c0_12] : memref<16x64xf32, #tpu.memory_space<vmem>>, vector<16x64xf32>
      tpu.vector_store %arg7[%c0_11, %c0_12], %12 {strides = array<i32>} : memref<16x64xf32, #tpu.memory_space<vmem>>, vector<16x64xf32>,
    } else {
    }
    %c0 = arith.constant 0 : index
    %c0_1 = arith.constant 0 : index
    %3 = vector.load %arg7[%c0, %c0_1] : memref<16x64xf32, #tpu.memory_space<vmem>>, vector<16x64xf32>
    %c0_2 = arith.constant 0 : index
    %c0_3 = arith.constant 0 : index
    %4 = vector.load %arg3[%c0_2, %c0_3] : memref<16x32xbf16, #tpu.memory_space<vmem>>, vector<16x32xbf16>
    %c0_4 = arith.constant 0 : index
    %c0_5 = arith.constant 0 : index
    %5 = vector.load %arg4[%c0_4, %c0_5] : memref<64x32xbf16, #tpu.memory_space<vmem>>, vector<64x32xbf16>
    %cst = arith.constant dense<0.000000e+00> : vector<16x64xf32>
    %6 = tpu.matmul %4, %5, %cst {dimension_numbers = #tpu.dot_dimension_numbers<[1], [1], [0], [0], [0, 0, 1, 0], [], []>} : vector<16x32xbf16>, vector<64x32xbf16>, vector<16x64xf32> -> vector<16x64xf32>
    %7 = arith.addf %3, %6 : vector<16x64xf32>
    %c0_6 = arith.constant 0 : index
    %c0_7 = arith.constant 0 : index
    %8 = vector.load %arg7[%c0_6, %c0_7] : memref<16x64xf32, #tpu.memory_space<vmem>>, vector<16x64xf32>
    tpu.vector_store %arg7[%c0_6, %c0_7], %7 {strides = array<i32>} : memref<16x64xf32, #tpu.memory_space<vmem>>, vector<16x64xf32>,
    %c0_i32_8 = arith.constant 0 : i32
    %9 = arith.cmpi eq, %arg2, %c0_i32_8 : i32
    %10 = arith.extui %9 : i1 to i32
    %c0_i32_9 = arith.constant 0 : i32
    %11 = arith.cmpi ne, %10, %c0_i32_9 : i32
    scf.if %11 {
      %c0_10 = arith.constant 0 : index
      %c0_11 = arith.constant 0 : index
      %12 = vector.load %arg7[%c0_10, %c0_11] : memref<16x64xf32, #tpu.memory_space<vmem>>, vector<16x64xf32>
      %c0_12 = arith.constant 0 : index
      %c0_13 = arith.constant 0 : index
      %13 = vector.load %arg5[%c0_12, %c0_13] : memref<1x64xf32, #tpu.memory_space<vmem>>, vector<1x64xf32>
      %14 = vector.broadcast %13 : vector<1x64xf32> to vector<16x64xf32>
      %15 = arith.mulf %12, %14 : vector<16x64xf32>
      %c0_14 = arith.constant 0 : index
      %c0_15 = arith.constant 0 : index
      %16 = vector.load %arg6[%c0_14, %c0_15] : memref<1x64xf32, #tpu.memory_space<vmem>>, vector<1x64xf32>
      %17 = vector.broadcast %16 : vector<1x64xf32> to vector<16x64xf32>
      %18 = arith.addf %15, %17 : vector<16x64xf32>
      %c0_16 = arith.constant 0 : index
      %c0_17 = arith.constant 0 : index
      %19 = vector.load %arg7[%c0_16, %c0_17] : memref<16x64xf32, #tpu.memory_space<vmem>>, vector<16x64xf32>
      tpu.vector_store %arg7[%c0_16, %c0_17], %18 {strides = array<i32>} : memref<16x64xf32, #tpu.memory_space<vmem>>, vector<16x64xf32>,
    } else {
    }
    return
  }
  func.func @transform_0(%arg0: i32, %arg1: i32, %arg2: i32) -> (i32, i32) {
    %c0_i32 = arith.constant 0 : i32
    return %arg0, %arg2 : i32, i32
  }
  func.func @transform_1(%arg0: i32, %arg1: i32, %arg2: i32) -> (i32, i32) {
    %c0_i32 = arith.constant 0 : i32
    return %arg1, %arg2 : i32, i32
  }
  func.func @transform_2(%arg0: i32, %arg1: i32, %arg2: i32) -> (i32, i32) {
    %c0_i32 = arith.constant 0 : i32
    %c0_i32_0 = arith.constant 0 : i32
    return %c0_i32, %arg1 : i32, i32
  }
  func.func @transform_3(%arg0: i32, %arg1: i32, %arg2: i32) -> (i32, i32) {
    %c0_i32 = arith.constant 0 : i32
    %c0_i32_0 = arith.constant 0 : i32
    return %c0_i32, %arg1 : i32, i32
  }
  func.func @transform_4(%arg0: i32, %arg1: i32, %arg2: i32) -> (i32, i32) {
    %c0_i32 = arith.constant 0 : i32
    return %arg0, %arg1 : i32, i32
  }
}

</mosaic_0001>

<bundles_post_ra>
// kernel: tpu_custom_call.1
= control target key start
LH: loop header
LB: loop body
LE: loop exit
PB: predicated region body
PF: predicated region fallthrough
CT: control target
= control target key end

     0   :  { %v223_v1 = vmov 0.0   ;;  %vm63_vm0 = vcmask 261120   ;;  %vm224_vm1 = vmmov 0   ;;  %vm23_vm2 = vcmask 523264   ;;  %s288_s0 = inlined_call_operand.vmem [shape: bf16[16,32], index: 0, kind: input, shape index: {}]   ;;  %s289_s1 = inlined_call_operand.vmem [shape: bf16[64,32], index: 1, kind: input, shape index: {}]   ;;  %s290_s2 = inlined_call_operand.vmem [shape: f32[1,64], index: 2, kind: input, shape index: {}]   ;;  %s291_s3 = inlined_call_operand.vmem [shape: f32[1,64], index: 3, kind: input, shape index: {}]   ;;  %s292_s4 = inlined_call_operand.hbm [shape: f32[16,64], index: 4, kind: output, shape index: {}]  }
   0x1   :  { %v196_v0 = vld [vmem:[%s289_s1 + $0x18] sm:$0xff]   ;;  %179 = vmatprep.subr.bf16.mxu0 %v223_v1  ;;  %v197_v3 = vld [vmem:[%s289_s1 + $0x10] sm:$0xff]   ;;  %187 = vmatprep.mubr.msk.bf16.mxu0 %vm224_vm1, %v223_v1 }
   0x2   :  { %v77_v2 = vsel %vm63_vm0, %v196_v0, 0 }
   0x3   :  { %180 = vmatpush3.bf16.xpose.msra.mxu0 %v77_v2 }
   0x4   :  { %181 = vmatprep.subr.bf16.mxu0 %v223_v1 }
   0x5   :  { %9 = vsyncpa [#allocation3], 0  ;;  %24 = vst.msk [vmem:[#allocation2] sm:$0xff] %vm23_vm2, %v223_v1  ;;  %v74_v4 = vsel %vm63_vm0, %v197_v3, 0  ;;  %v198_v5 = vld [vmem:[%s289_s1 + $0x8] sm:$0xff]   ;;  %v199_v7 = vld [vmem:[%s289_s1] sm:$0xff]  }
   0x6   :  { %25 = vst.msk [vmem:[#allocation2 + $0x8] sm:$0xff] %vm23_vm2, %v223_v1  ;;  %v71_v6 = vsel %vm63_vm0, %v198_v5, 0  ;;  %v68_v8 = vsel %vm63_vm0, %v199_v7, 0  ;;  %v200_v9 = vld [vmem:[%s288_s0] sm:$0xff]   ;;  %s225_s27 = smov [#allocation2]  }
   0x7   :  { %v172_v18 = vld [vmem:[%s290_s2] ss:$0 sm:$0xff]  ;;  %s155_s28 = sshll.u32 %s225_s27, 4  ;;  %s156_s28 = int_to_ptr.vmem [resolvable:$true] %s155_s28 }
   0x8   :  { %v173_v20 = vld [vmem:[%s291_s3] ss:$0 sm:$0xff]  ;;  %s201_s29 = scalar_lea.vmem %s156_s28, 256  ;;  %p206_p1 = scmp.lt.s32.totalorder %s156_s28, %s156_s28 }
   0x9   :  { %p202_p0 = scmp.ne.s32.totalorder %s156_s28, %s201_s29  ;;  %p207_p2 = scmp.lt.s32.totalorder %s201_s29, %s201_s29 }
   0xb   :  { %182 = vmatpush3.bf16.xpose.msra.mxu0 %v74_v4  ;;  %p208_p3 = por %p207_p2, %p206_p1 }
   0xc   :  { %183 = vmatprep.subr.bf16.mxu0 %v223_v1  ;;  %v26_v10 = vld [vmem:[#allocation2] sm:$0xff] }
   0xd   :  { %v27_v14 = vld [vmem:[#allocation2 + $0x8] sm:$0xff]  ;;  %p209_p4 = pnand %p208_p3, %p202_p0 }
  0x13   :  { %184 = vmatpush3.bf16.xpose.msra.mxu0 %v71_v6 }
  0x14   :  { %185 = vmatprep.subr.bf16.mxu0 %v223_v1 }
  0x1b   :  { %186 = vmatpush3.bf16.xpose.msra.mxu0 %v68_v8 }
  0x22   :  { %188 = vmatmul.mubr.msk.bf16.vlgmr.msra.gmra.mxu0 %vm63_vm0, %v200_v9 }
  0xe2   :  { %v113_v11 = vpop.f32.mrf.mxu0 }
  0xe3   :  { %v120_v12 = vadd.f32 %v113_v11, %v26_v10 }
  0xe4   :  { %v189_v13 = vpop.f32.mrf.mxu0 }
  0xe5   :  { %123 = vst.msk [vmem:[#allocation2] sm:$0xff] %vm23_vm2, %v120_v12 }
  0xe6   :  { %v116_v15 = vpop.f32.mrf.mxu0 }
  0xe7   :  { %v121_v16 = vadd.f32 %v116_v15, %v27_v14 }
  0xe8   :  { %v190_v17 = vpop.f32.mrf.mxu0 }
  0xe9   :  { %124 = vst.msk [vmem:[#allocation2 + $0x8] sm:$0xff] %vm23_vm2, %v121_v16 }
  0xec   :  { %v128_v19 = vld [vmem:[#allocation2] sm:$0xff] }
  0xed   :  { %v137_v21 = vmul.f32 %v172_v18, %v128_v19 }
  0xef   :  { %v146_v22 = vadd.f32 %v173_v20, %v137_v21 }
  0xf0   :  { %v129_v23 = vld [vmem:[#allocation2 + $0x8] sm:$0xff] }
  0xf1   :  { %v138_v24 = vmul.f32 %v172_v18, %v129_v23  ;;  %148 = vst.msk [vmem:[#allocation2] sm:$0xff] %vm23_vm2, %v146_v22 }
  0xf3   :  { %v147_v25 = vadd.f32 %v173_v20, %v138_v24 }
  0xf5   :  { %149 = vst.msk [vmem:[#allocation2 + $0x8] sm:$0xff] %vm23_vm2, %v147_v25 }
  0xf6   :  { %212 = shalt.err (!%p209_p4)
}
  0xf7   :  { %s226_s2 = smov 128   ;;  %s227_s3 = smov 8  }
  0xf8   :  { %161 = dma.vmem_to_hbm [thread:$0]  %s156_s28, 256, %s292_s4, [#allocation3], %s226_s2, %s226_s2, %s227_s3  }
  0xf9   :  { %221 = dma.done.wait [#allocation3], 256  }
  0xfa   :  { %222 = vsyncadd [#allocation3], 4294967040 }
  0xfb   :  { %165 = vsyncpa [#allocation3], 1 }

</bundles_post_ra>
